<compile_context>
chip_gen: v5e
topology: v5e:2x2
jax: 0.10.0
libtpu: 0.0.40
codegen_flags: <defaults>
</compile_context>

<pallas_src>
import functools

import jax
import jax.numpy as jnp
from jax.experimental import pallas as pl
from jax.experimental.pallas import tpu as pltpu

SIZE = 128  # hidden width, fixed in the PyTorch module


def _round_up(n, m):
    return ((n + m - 1) // m) * m


def central_critic_kernel(
    x_ref,        # (TB, in_dim)        compute dtype (f32 or bf16)
    w1_ref,       # (in_dim, 128)       compute dtype
    w2_ref,       # (128, 128)          compute dtype
    w34_ref,      # (128, 256)          fc3 | fc4 fused along output dim
    ba12_ref,     # (4, 128)  f32       rows: b1, a1, b2, a2
    ba34w_ref,    # (3, 256)  f32       rows: [b3|b4], [a3|a4], [wq1^T|wq2^T]
    q_ref,        # (TB, 2)   f32       columns: q1, q2 (head biases added in wrapper)
):
    cdt = w1_ref.dtype  # matmul compute dtype (f32 or bf16)
    x = x_ref[...]

    # Packed bias / PReLU-alpha / head-weight rows (f32, broadcast over batch).
    b1 = ba12_ref[0:1, :]
    a1 = ba12_ref[1:2, :]
    b2 = ba12_ref[2:3, :]
    a2 = ba12_ref[3:4, :]
    b34 = ba34w_ref[0:1, :]
    a34 = ba34w_ref[1:2, :]
    wq_row = ba34w_ref[2:3, :]

    # fc1 + PReLU1 (accumulate f32, store intermediate in compute dtype).
    h = jnp.dot(x, w1_ref[...], preferred_element_type=jnp.float32) + b1
    h = jnp.where(h > 0, h, a1 * h).astype(cdt)

    # fc2 + PReLU2
    h = jnp.dot(h, w2_ref[...], preferred_element_type=jnp.float32) + b2
    h = jnp.where(h > 0, h, a2 * h).astype(cdt)

    # fc3 | fc4 fused (single 256-wide matmul) + PReLU3 | PReLU4.
    # Kept in f32: it only feeds the VPU/XLU head reduction below, and the
    # 128-term lane sum is more accurate in f32.
    h12 = jnp.dot(h, w34_ref[...], preferred_element_type=jnp.float32) + b34
    h12 = jnp.where(h12 > 0, h12, a34 * h12)

    # Twin heads: VPU multiply + XLU lane reduction instead of an N=2 MXU
    # matmul (saves ~25% of vmatmul pushes per tile; co-issues off the MXU).
    prod = h12 * wq_row                               # (TB, 256) f32, VPU
    q1 = jnp.sum(prod[:, :SIZE], axis=-1, keepdims=True)   # x1 @ wq1
    q2 = jnp.sum(prod[:, SIZE:], axis=-1, keepdims=True)   # x2 @ wq2
    q_ref[:, 0:1] = q1.astype(q_ref.dtype)
    q_ref[:, 1:2] = q2.astype(q_ref.dtype)


def init_params(key, state_dim, action_dim):
    """Deterministic synthetic parameters (shapes match the PyTorch module)."""
    in_dim = state_dim + action_dim
    ks = jax.random.split(key, 12)

    def lin(kw, kb, fan_in, fan_out):
        bound = 1.0 / jnp.sqrt(fan_in)
        w = jax.random.uniform(kw, (fan_in, fan_out), jnp.float32, -bound, bound)
        b = jax.random.uniform(kb, (1, fan_out), jnp.float32, -bound, bound)
        return w, b

    w1, b1 = lin(ks[0], ks[1], in_dim, SIZE)
    w2, b2 = lin(ks[2], ks[3], SIZE, SIZE)
    w3, b3 = lin(ks[4], ks[5], SIZE, SIZE)
    w4, b4 = lin(ks[6], ks[7], SIZE, SIZE)
    wq1, bq1 = lin(ks[8], ks[9], SIZE, 1)
    wq2, bq2 = lin(ks[10], ks[11], SIZE, 1)

    # PReLU default init in PyTorch: alpha = 0.25 per channel.
    a1 = jnp.full((1, SIZE), 0.25, jnp.float32)
    a2 = jnp.full((1, SIZE), 0.25, jnp.float32)
    a3 = jnp.full((1, SIZE), 0.25, jnp.float32)
    a4 = jnp.full((1, SIZE), 0.25, jnp.float32)

    return dict(
        w1=w1, b1=b1, a1=a1,
        w2=w2, b2=b2, a2=a2,
        w3=w3, b3=b3, a3=a3,
        w4=w4, b4=b4, a4=a4,
        wq1=wq1, bq1=bq1,
        wq2=wq2, bq2=bq2,
    )


def pack_params(p, compute_dtype=jnp.bfloat16):
    """Fuse / pack logical parameters into the 5 kernel weight operands.

    bf16 by default (MXU throughput path, f32 accumulation in-kernel); pass
    compute_dtype=jnp.float32 for an exact match against the f32 reference.
    Biases / PReLU alphas / head weights stay f32.
    """
    w1 = p["w1"].astype(compute_dtype)
    w2 = p["w2"].astype(compute_dtype)
    # fc3 | fc4 fused along the output dim -> (128, 256).
    w34 = jnp.concatenate([p["w3"], p["w4"]], axis=1).astype(compute_dtype)
    # Packed small rows.
    ba12 = jnp.concatenate([p["b1"], p["a1"], p["b2"], p["a2"]], axis=0)   # (4, 128)
    b34 = jnp.concatenate([p["b3"], p["b4"]], axis=1)                      # (1, 256)
    a34 = jnp.concatenate([p["a3"], p["a4"]], axis=1)                      # (1, 256)
    wq_row = jnp.concatenate([p["wq1"].T, p["wq2"].T], axis=1)             # (1, 256)
    ba34w = jnp.concatenate([b34, a34, wq_row], axis=0)                    # (3, 256)
    return dict(w1=w1, w2=w2, w34=w34, ba12=ba12, ba34w=ba34w,
                bq1=p["bq1"], bq2=p["bq2"])


@functools.partial(jax.jit, static_argnames=("batch_tile",))
def central_critic_forward(x, kp, *, batch_tile=2048):
    """x: (B, state_dim+action_dim).  kp: output of pack_params."""
    B, in_dim = x.shape
    cdt = kp["w1"].dtype
    x = x.astype(cdt)   # halves x DMA bytes on the bf16 path

    # Batch tile selection:
    #   * cap at batch_tile (2048 fits easily in VMEM: a few MiB per tile),
    #   * for B >= 256 guarantee >= 2 grid steps so both v7x TensorCores get a
    #     tile via dimension_semantics=("parallel",),
    #   * keep a multiple of 8 (sublane granularity).
    TWO_TILE_MIN_B = 256
    if B >= TWO_TILE_MIN_B:
        TB = min(batch_tile, _round_up((B + 1) // 2, 8))
    else:
        TB = _round_up(max(B, 1), 8)
    B_pad = _round_up(B, TB)
    if B_pad != B:
        x = jnp.pad(x, ((0, B_pad - B), (0, 0)))

    grid = (B_pad // TB,)

    def tiled(shape):      # batch-tiled operand (x / q)
        return pl.BlockSpec(shape, lambda i: (i, 0))

    def resident(shape):   # grid-invariant operand (weights / packed biases)
        return pl.BlockSpec(shape, lambda i: (0, 0))
    # TODO(synk): single-buffer the resident operands (pipeline_mode=pl.Buffered(1))
    # once verified supported by the installed Mosaic lowering; revisited blocks
    # are already not re-DMA'd across grid steps.

    # Scheduling hint for XLA.
    flops = 2 * B_pad * (in_dim * SIZE + SIZE * SIZE + SIZE * 2 * SIZE + 2 * SIZE)
    weight_bytes = sum(int(kp[k].size) * kp[k].dtype.itemsize
                       for k in ("w1", "w2", "w34", "ba12", "ba34w"))
    bytes_accessed = B_pad * in_dim * x.dtype.itemsize + weight_bytes + B_pad * 2 * 4

    q = pl.pallas_call(
        central_critic_kernel,
        out_shape=jax.ShapeDtypeStruct((B_pad, 2), jnp.float32),
        grid=grid,
        in_specs=[
            tiled((TB, in_dim)),                 # x
            resident((in_dim, SIZE)),            # w1
            resident((SIZE, SIZE)),              # w2
            resident((SIZE, 2 * SIZE)),          # w34
            resident((4, SIZE)),                 # ba12
            resident((3, 2 * SIZE)),             # ba34w (b3|b4, a3|a4, wq1|wq2)
        ],
        out_specs=tiled((TB, 2)),
        compiler_params=pltpu.CompilerParams(
            dimension_semantics=("parallel",),   # shard batch tiles across TCs (v7x)
        ),
        cost_estimate=pl.CostEstimate(
            flops=flops, transcendentals=0, bytes_accessed=bytes_accessed),
    )(x, kp["w1"], kp["w2"], kp["w34"], kp["ba12"], kp["ba34w"])

    # Split the fused (B, 2) head output back into q1 / q2 and add head biases
    # (dropped from the kernel to remove one padded VMEM tile + DMA descriptor).
    q1 = q[:B, 0:1] + kp["bq1"]
    q2 = q[:B, 1:2] + kp["bq2"]
    return q1, q2
    # TODO(synk): for actor-loop inference at tiny B, keep the packed weights
    # VMEM-resident across calls (cross-pallas_call prefetch, P10 pattern)
    # instead of re-DMAing ~0.25 MB of bf16 params per invocation.


def reference_forward(x, p):
    def prelu(v, a):
        return jnp.where(v > 0, v, a * v)

    h = prelu(x @ p["w1"] + p["b1"], p["a1"])
    h = prelu(h @ p["w2"] + p["b2"], p["a2"])
    h1 = prelu(h @ p["w3"] + p["b3"], p["a3"])
    h2 = prelu(h @ p["w4"] + p["b4"], p["a4"])
    q1 = h1 @ p["wq1"] + p["bq1"]
    q2 = h2 @ p["wq2"] + p["bq2"]
    return q1, q2


if __name__ == "__main__":
    state_dim, action_dim = 16, 8
    batch = 8

    key = jax.random.PRNGKey(0)
    kx, kparam = jax.random.split(key)
    x = jax.random.normal(kx, (batch, state_dim + action_dim), jnp.float32)
    params = init_params(kparam, state_dim, action_dim)

    rq1, rq2 = reference_forward(x, params)

    # Exact f32 verification path.
    kp_f32 = pack_params(params, compute_dtype=jnp.float32)
    q1, q2 = central_critic_forward(x, kp_f32)
    jax.block_until_ready((q1, q2))
    assert q1.shape == (batch, 1) and q2.shape == (batch, 1)
    assert jnp.allclose(q1, rq1, atol=1e-4, rtol=1e-4)
    assert jnp.allclose(q2, rq2, atol=1e-4, rtol=1e-4)

    # Default bf16 MXU path (f32 accumulation), relaxed tolerance.
    kp_bf16 = pack_params(params)  # compute_dtype=jnp.bfloat16
    q1b, q2b = central_critic_forward(x, kp_bf16)
    jax.block_until_ready((q1b, q2b))
    assert q1b.shape == (batch, 1) and q2b.shape == (batch, 1)
    assert jnp.allclose(q1b, rq1, atol=2e-2, rtol=2e-2)
    assert jnp.allclose(q2b, rq2, atol=2e-2, rtol=2e-2)

    print("KERNEL_OK")
</pallas_src>

<mosaic_0001>
module attributes {stable_mosaic.version = 11 : i64} {
  func.func @central_critic_kernel(%arg0: i32, %arg1: memref<8x24xf32, #tpu.memory_space<vmem>>, %arg2: memref<24x128xf32, #tpu.memory_space<vmem>>, %arg3: memref<128x128xf32, #tpu.memory_space<vmem>>, %arg4: memref<128x256xf32, #tpu.memory_space<vmem>>, %arg5: memref<4x128xf32, #tpu.memory_space<vmem>>, %arg6: memref<3x256xf32, #tpu.memory_space<vmem>>, %arg7: memref<8x2xf32, #tpu.memory_space<vmem>>) attributes {dimension_semantics = [#tpu.dimension_semantics<parallel>], iteration_bounds = array<i64: 1>, scalar_prefetch = 0 : i64, scratch_operands = 0 : i64, tpu.core_type = #tpu.core_type<tc>, window_params = [{transform_indices = @transform_0, window_bounds = array<i64: 8, 24>}, {pipeline_mode = #tpu.pipeline_mode<synchronous>, transform_indices = @transform_1, window_bounds = array<i64: 24, 128>}, {pipeline_mode = #tpu.pipeline_mode<synchronous>, transform_indices = @transform_2, window_bounds = array<i64: 128, 128>}, {pipeline_mode = #tpu.pipeline_mode<synchronous>, transform_indices = @transform_3, window_bounds = array<i64: 128, 256>}, {pipeline_mode = #tpu.pipeline_mode<synchronous>, transform_indices = @transform_4, window_bounds = array<i64: 4, 128>}, {pipeline_mode = #tpu.pipeline_mode<synchronous>, transform_indices = @transform_5, window_bounds = array<i64: 3, 256>}, {transform_indices = @transform_6, window_bounds = array<i64: 8, 2>}]} {
    %c0 = arith.constant 0 : index
    %c0_0 = arith.constant 0 : index
    %0 = vector.load %arg1[%c0, %c0_0] : memref<8x24xf32, #tpu.memory_space<vmem>>, vector<8x24xf32>
    %c0_1 = arith.constant 0 : index
    %c0_2 = arith.constant 0 : index
    %1 = vector.load %arg5[%c0_1, %c0_2] : memref<4x128xf32, #tpu.memory_space<vmem>>, vector<1x128xf32>
    %c1 = arith.constant 1 : index
    %c0_3 = arith.constant 0 : index
    %2 = vector.load %arg5[%c1, %c0_3] : memref<4x128xf32, #tpu.memory_space<vmem>>, vector<1x128xf32>
    %c2 = arith.constant 2 : index
    %c0_4 = arith.constant 0 : index
    %3 = vector.load %arg5[%c2, %c0_4] : memref<4x128xf32, #tpu.memory_space<vmem>>, vector<1x128xf32>
    %c3 = arith.constant 3 : index
    %c0_5 = arith.constant 0 : index
    %4 = vector.load %arg5[%c3, %c0_5] : memref<4x128xf32, #tpu.memory_space<vmem>>, vector<1x128xf32>
    %c0_6 = arith.constant 0 : index
    %c0_7 = arith.constant 0 : index
    %5 = vector.load %arg6[%c0_6, %c0_7] : memref<3x256xf32, #tpu.memory_space<vmem>>, vector<1x256xf32>
    %c1_8 = arith.constant 1 : index
    %c0_9 = arith.constant 0 : index
    %6 = vector.load %arg6[%c1_8, %c0_9] : memref<3x256xf32, #tpu.memory_space<vmem>>, vector<1x256xf32>
    %c2_10 = arith.constant 2 : index
    %c0_11 = arith.constant 0 : index
    %7 = vector.load %arg6[%c2_10, %c0_11] : memref<3x256xf32, #tpu.memory_space<vmem>>, vector<1x256xf32>
    %c0_12 = arith.constant 0 : index
    %c0_13 = arith.constant 0 : index
    %8 = vector.load %arg2[%c0_12, %c0_13] : memref<24x128xf32, #tpu.memory_space<vmem>>, vector<24x128xf32>
    %cst = arith.constant dense<0.000000e+00> : vector<8x128xf32>
    %9 = tpu.matmul %0, %8, %cst {dimension_numbers = #tpu.dot_dimension_numbers<[1], [0], [0], [1], [0, 0, 1, 1], [], []>} : vector<8x24xf32>, vector<24x128xf32>, vector<8x128xf32> -> vector<8x128xf32>
    %10 = vector.broadcast %1 : vector<1x128xf32> to vector<8x128xf32>
    %11 = arith.addf %9, %10 : vector<8x128xf32>
    %cst_14 = arith.constant 0.000000e+00 : f32
    %12 = vector.broadcast %cst_14 : f32 to vector<8x128xf32>
    %13 = arith.cmpf ogt, %11, %12 : vector<8x128xf32>
    %14 = vector.broadcast %2 : vector<1x128xf32> to vector<8x128xf32>
    %15 = arith.mulf %14, %11 : vector<8x128xf32>
    %16 = arith.select %13, %11, %15 : vector<8x128xi1>, vector<8x128xf32>
    %c0_15 = arith.constant 0 : index
    %c0_16 = arith.constant 0 : index
    %17 = vector.load %arg3[%c0_15, %c0_16] : memref<128x128xf32, #tpu.memory_space<vmem>>, vector<128x128xf32>
    %cst_17 = arith.constant dense<0.000000e+00> : vector<8x128xf32>
    %18 = tpu.matmul %16, %17, %cst_17 {dimension_numbers = #tpu.dot_dimension_numbers<[1], [0], [0], [1], [0, 0, 1, 1], [], []>} : vector<8x128xf32>, vector<128x128xf32>, vector<8x128xf32> -> vector<8x128xf32>
    %19 = vector.broadcast %3 : vector<1x128xf32> to vector<8x128xf32>
    %20 = arith.addf %18, %19 : vector<8x128xf32>
    %cst_18 = arith.constant 0.000000e+00 : f32
    %21 = vector.broadcast %cst_18 : f32 to vector<8x128xf32>
    %22 = arith.cmpf ogt, %20, %21 : vector<8x128xf32>
    %23 = vector.broadcast %4 : vector<1x128xf32> to vector<8x128xf32>
    %24 = arith.mulf %23, %20 : vector<8x128xf32>
    %25 = arith.select %22, %20, %24 : vector<8x128xi1>, vector<8x128xf32>
    %c0_19 = arith.constant 0 : index
    %c0_20 = arith.constant 0 : index
    %26 = vector.load %arg4[%c0_19, %c0_20] : memref<128x256xf32, #tpu.memory_space<vmem>>, vector<128x256xf32>
    %cst_21 = arith.constant dense<0.000000e+00> : vector<8x256xf32>
    %27 = tpu.matmul %25, %26, %cst_21 {dimension_numbers = #tpu.dot_dimension_numbers<[1], [0], [0], [1], [0, 0, 1, 1], [], []>} : vector<8x128xf32>, vector<128x256xf32>, vector<8x256xf32> -> vector<8x256xf32>
    %28 = vector.broadcast %5 : vector<1x256xf32> to vector<8x256xf32>
    %29 = arith.addf %27, %28 : vector<8x256xf32>
    %cst_22 = arith.constant 0.000000e+00 : f32
    %30 = vector.broadcast %cst_22 : f32 to vector<8x256xf32>
    %31 = arith.cmpf ogt, %29, %30 : vector<8x256xf32>
    %32 = vector.broadcast %6 : vector<1x256xf32> to vector<8x256xf32>
    %33 = arith.mulf %32, %29 : vector<8x256xf32>
    %34 = arith.select %31, %29, %33 : vector<8x256xi1>, vector<8x256xf32>
    %35 = vector.broadcast %7 : vector<1x256xf32> to vector<8x256xf32>
    %36 = arith.mulf %34, %35 : vector<8x256xf32>
    %37 = vector.extract_strided_slice %36 {offsets = [0, 0], sizes = [8, 128], strides = [1, 1]} : vector<8x256xf32> to vector<8x128xf32>
    %cst_23 = arith.constant dense<0.000000e+00> : vector<8xf32>
    %38 = vector.multi_reduction <add>, %37, %cst_23 [1] : vector<8x128xf32> to vector<8xf32>
    %39 = vector.shape_cast %38 : vector<8xf32> to vector<8x1xf32>
    %40 = vector.extract_strided_slice %36 {offsets = [0, 128], sizes = [8, 128], strides = [1, 1]} : vector<8x256xf32> to vector<8x128xf32>
    %cst_24 = arith.constant dense<0.000000e+00> : vector<8xf32>
    %41 = vector.multi_reduction <add>, %40, %cst_24 [1] : vector<8x128xf32> to vector<8xf32>
    %42 = vector.shape_cast %41 : vector<8xf32> to vector<8x1xf32>
    %c0_25 = arith.constant 0 : index
    %c0_26 = arith.constant 0 : index
    %43 = vector.load %arg7[%c0_25, %c0_26] : memref<8x2xf32, #tpu.memory_space<vmem>>, vector<8x1xf32>
    tpu.vector_store %arg7[%c0_25, %c0_26], %39 {strides = array<i32>} : memref<8x2xf32, #tpu.memory_space<vmem>>, vector<8x1xf32>,
    %c0_27 = arith.constant 0 : index
    %c1_28 = arith.constant 1 : index
    %44 = vector.load %arg7[%c0_27, %c1_28] : memref<8x2xf32, #tpu.memory_space<vmem>>, vector<8x1xf32>
    tpu.vector_store %arg7[%c0_27, %c1_28], %42 {strides = array<i32>} : memref<8x2xf32, #tpu.memory_space<vmem>>, vector<8x1xf32>,
    return
  }
  func.func @transform_0(%arg0: i32) -> (i32, i32) {
    %c0_i32 = arith.constant 0 : i32
    %c0_i32_0 = arith.constant 0 : i32
    return %arg0, %c0_i32 : i32, i32
  }
  func.func @transform_1(%arg0: i32) -> (i32, i32) {
    %c0_i32 = arith.constant 0 : i32
    %c0_i32_0 = arith.constant 0 : i32
    %c0_i32_1 = arith.constant 0 : i32
    return %c0_i32, %c0_i32_0 : i32, i32
  }
  func.func @transform_2(%arg0: i32) -> (i32, i32) {
    %c0_i32 = arith.constant 0 : i32
    %c0_i32_0 = arith.constant 0 : i32
    %c0_i32_1 = arith.constant 0 : i32
    return %c0_i32, %c0_i32_0 : i32, i32
  }
  func.func @transform_3(%arg0: i32) -> (i32, i32) {
    %c0_i32 = arith.constant 0 : i32
    %c0_i32_0 = arith.constant 0 : i32
    %c0_i32_1 = arith.constant 0 : i32
    return %c0_i32, %c0_i32_0 : i32, i32
  }
  func.func @transform_4(%arg0: i32) -> (i32, i32) {
    %c0_i32 = arith.constant 0 : i32
    %c0_i32_0 = arith.constant 0 : i32
    %c0_i32_1 = arith.constant 0 : i32
    return %c0_i32, %c0_i32_0 : i32, i32
  }
  func.func @transform_5(%arg0: i32) -> (i32, i32) {
    %c0_i32 = arith.constant 0 : i32
    %c0_i32_0 = arith.constant 0 : i32
    %c0_i32_1 = arith.constant 0 : i32
    return %c0_i32, %c0_i32_0 : i32, i32
  }
  func.func @transform_6(%arg0: i32) -> (i32, i32) {
    %c0_i32 = arith.constant 0 : i32
    %c0_i32_0 = arith.constant 0 : i32
    return %arg0, %c0_i32 : i32, i32
  }
}

</mosaic_0001>

<bundles_post_ra>
// kernel: central_critic_forward.1
= control target key start
LH: loop header
LB: loop body
LE: loop exit
PB: predicated region body
PF: predicated region fallthrough
CT: control target
= control target key end

     0   :  { %11 = vsyncpa [#allocation3], 0  ;;  %s507_s0 = inlined_call_operand.hbm [shape: f32[8,24], index: 0, kind: input, shape index: {}]   ;;  %s508_s1 = inlined_call_operand.hbm [shape: f32[24,128], index: 1, kind: input, shape index: {}]   ;;  %s509_s2 = inlined_call_operand.hbm [shape: f32[128,128], index: 2, kind: input, shape index: {}]   ;;  %s510_s3 = inlined_call_operand.hbm [shape: f32[128,256], index: 3, kind: input, shape index: {}]   ;;  %s511_s4 = inlined_call_operand.vmem [shape: f32[4,128], index: 4, kind: input, shape index: {}]   ;;  %s512_s5 = inlined_call_operand.hbm [shape: f32[3,256], index: 5, kind: input, shape index: {}]   ;;  %s513_s6 = inlined_call_operand.vmem [shape: f32[8,2], index: 6, kind: output, shape index: {}]  }
   0x1   :  { %12 = vsyncpa [#allocation5], 0  ;;  %s29_s23 = sshll.u32 %s508_s1, 4  ;;  %s30_s23 = int_to_ptr.hbm [resolvable:$true] %s29_s23 }
   0x2   :  { %13 = vsyncpa [#allocation8], 0  ;;  %s430_s24 = smov [#allocation4]   ;;  %s55_s28 = sshll.u32 %s510_s3, 4  ;;  %s56_s28 = int_to_ptr.hbm [resolvable:$true] %s55_s28 }
   0x3   :  { %s31_s25 = sshll.u32 %s430_s24, 4  ;;  %s431_s29 = smov 128   ;;  %s32_s25 = int_to_ptr.vmem [resolvable:$true] %s31_s25 }
   0x4   :  { %s432_s30 = smov 8   ;;  %s433_s7 = smov [#allocation7]  }
   0x5   :  { %37 = dma.hbm_to_vmem [thread:$0]  %s30_s23, 384, %s32_s25, [#allocation5], %s431_s29, %s431_s29, %s432_s30  }
   0x6   :  { %s57_s8 = sshll.u32 %s433_s7, 4  ;;  %s434_s9 = smov 256   ;;  %s58_s8 = int_to_ptr.vmem [resolvable:$true] %s57_s8 }
   0x7   :  { %s435_s10 = smov 16   ;;  %s19_s12 = sshll.u32 %s507_s0, 4  ;;  %s20_s12 = int_to_ptr.hbm [resolvable:$true] %s19_s12 }
   0x8   :  { %63 = dma.hbm_to_vmem [thread:$0]  %s56_s28, 4096, %s58_s8, [#allocation8], %s434_s9, %s434_s9, %s435_s10  }
   0x9   :  { %s436_s13 = smov [#allocation2]   ;;  %s42_s16 = sshll.u32 %s509_s2, 4  ;;  %s43_s16 = int_to_ptr.hbm [resolvable:$true] %s42_s16 }
   0xa   :  { %s21_s14 = sshll.u32 %s436_s13, 4  ;;  %s437_s17 = smov [#allocation6]   ;;  %s22_s14 = int_to_ptr.vmem [resolvable:$true] %s21_s14 }
   0xb   :  { %24 = dma.hbm_to_vmem [thread:$0]  %s20_s12, 128, %s22_s14, [#allocation3]  }
   0xc   :  { %s44_s18 = sshll.u32 %s437_s17, 4  ;;  %s71_s21 = sshll.u32 %s512_s5, 4  ;;  %s45_s18 = int_to_ptr.vmem [resolvable:$true] %s44_s18  ;;  %s72_s21 = int_to_ptr.hbm [resolvable:$true] %s71_s21 }
   0xd   :  { %50 = dma.hbm_to_vmem [thread:$0]  %s43_s16, 2048, %s45_s18, [#allocation5], %s431_s29, %s431_s29, %s432_s30  }
   0xe   :  { %s438_s0 = smov [#allocation9]  }
   0xf   :  { %s73_s22 = sshll.u32 %s438_s0, 4  ;;  %s74_s22 = int_to_ptr.vmem [resolvable:$true] %s73_s22 }
  0x10   :  { %76 = dma.hbm_to_vmem [thread:$0]  %s72_s21, 128, %s74_s22, [#allocation8]  }
  0x11   :  { %424 = dma.done.wait [#allocation3], 128  }
  0x12   :  { %425 = vsyncadd [#allocation3], 4294967168 }
  0x13   :  { %426 = dma.done.wait [#allocation5], 2432  }
  0x14   :  { %427 = vsyncadd [#allocation5], 4294964864 }
  0x15   :  { %428 = dma.done.wait [#allocation8], 4224  }
  0x16   :  { %429 = vsyncadd [#allocation8], 4294963072  ;;  %v109_v0 = vld [vmem:[#allocation4 + $0x10] sm:$0xff]  ;;  %v108_v1 = vld [vmem:[#allocation4 + $0x8] sm:$0xff]  ;;  %vm111_vm0 = vcmask 195584   ;;  %vm279_vm5 = vcmask 7168  }
  0x17   :  { %128 = vmatpush.msra.mxu0 %v109_v0  ;;  %v154_v2 = vld [vmem:[#allocation6 + $0x78] sm:$0xff]  ;;  %v153_v3 = vld [vmem:[#allocation6 + $0x70] sm:$0xff]  ;;  %v107_v4 = vld [vmem:[#allocation4] sm:$0xff]  ;;  %vm281_vm6 = vcmask 15368  }
  0x18   :  { %156 = vmatpush.msra.mxu1 %v154_v2  ;;  %v97_v5 = vld [vmem:[#allocation2] sm:$0xff]  ;;  %v152_v6 = vld [vmem:[#allocation6 + $0x68] sm:$0xff]  ;;  %v150_v8 = vld [vmem:[#allocation6 + $0x58] sm:$0xff] }
  0x19   :  { %129 = vmatpush.msra.mxu0 %v108_v1  ;;  %v151_v7 = vld [vmem:[#allocation6 + $0x60] sm:$0xff]  ;;  %v149_v9 = vld [vmem:[#allocation6 + $0x50] sm:$0xff]  ;;  %v148_v10 = vld [vmem:[#allocation6 + $0x48] sm:$0xff] }
  0x1a   :  { %157 = vmatpush.msra.mxu1 %v153_v3  ;;  %v147_v11 = vld [vmem:[#allocation6 + $0x40] sm:$0xff]  ;;  %v146_v12 = vld [vmem:[#allocation6 + $0x38] sm:$0xff]  ;;  %v145_v13 = vld [vmem:[#allocation6 + $0x30] sm:$0xff] }
  0x1b   :  { %130 = vmatpush.msra.mxu0 %v107_v4  ;;  %v144_v14 = vld [vmem:[#allocation6 + $0x28] sm:$0xff]  ;;  %v143_v15 = vld [vmem:[#allocation6 + $0x20] sm:$0xff]  ;;  %v142_v16 = vld [vmem:[#allocation6 + $0x18] sm:$0xff] }
  0x1c   :  { %290 = vmatmul.msk.f32.vlgmr.msra.gmra.mxu0 %vm111_vm0, %v97_v5  ;;  %158 = vmatpush.msra.mxu1 %v152_v6  ;;  %v141_v17 = vld [vmem:[#allocation6 + $0x10] sm:$0xff]  ;;  %v140_v18 = vld [vmem:[#allocation6 + $0x8] sm:$0xff]  ;;  %v139_v19 = vld [vmem:[#allocation6] sm:$0xff] }
  0x1d   :  { %v210_v20 = vld [vmem:[#allocation7 + $0xf0] sm:$0xff]  ;;  %v211_v21 = vld [vmem:[#allocation7 + $0xf8] sm:$0xff]  ;;  %v208_v22 = vld [vmem:[#allocation7 + $0xe0] sm:$0xff] }
  0x1e   :  { %159 = vmatpush.msra.mxu1 %v151_v7  ;;  %217 = vmatpush.msra.mxu2 %v210_v20  ;;  %v209_v23 = vld [vmem:[#allocation7 + $0xe8] sm:$0xff]  ;;  %v206_v24 = vld [vmem:[#allocation7 + $0xd0] sm:$0xff]  ;;  %v207_v25 = vld [vmem:[#allocation7 + $0xd8] sm:$0xff] }
  0x1f   :  { %237 = vmatpush.msra.mxu3 %v211_v21  ;;  %v204_v26 = vld [vmem:[#allocation7 + $0xc0] sm:$0xff]  ;;  %v205_v27 = vld [vmem:[#allocation7 + $0xc8] sm:$0xff]  ;;  %v202_v28 = vld [vmem:[#allocation7 + $0xb0] sm:$0xff] }
  0x20   :  { %160 = vmatpush.msra.mxu1 %v150_v8  ;;  %218 = vmatpush.msra.mxu2 %v208_v22  ;;  %v203_v29 = vld [vmem:[#allocation7 + $0xb8] sm:$0xff]  ;;  %v200_v30 = vld [vmem:[#allocation7 + $0xa0] sm:$0xff]  ;;  %v201_v31 = vld [vmem:[#allocation7 + $0xa8] sm:$0xff] }
  0x21   :  { %238 = vmatpush.msra.mxu3 %v209_v23  ;;  %v198_v32 = vld [vmem:[#allocation7 + $0x90] sm:$0xff]  ;;  %v199_v33 = vld [vmem:[#allocation7 + $0x98] sm:$0xff]  ;;  %v196_v34 = vld [vmem:[#allocation7 + $0x80] sm:$0xff] }
  0x22   :  { %161 = vmatpush.msra.mxu1 %v149_v9  ;;  %219 = vmatpush.msra.mxu2 %v206_v24  ;;  %v197_v35 = vld [vmem:[#allocation7 + $0x88] sm:$0xff]  ;;  %v194_v36 = vld [vmem:[#allocation7 + $0x70] sm:$0xff]  ;;  %v195_v37 = vld [vmem:[#allocation7 + $0x78] sm:$0xff] }
  0x23   :  { %239 = vmatpush.msra.mxu3 %v207_v25  ;;  %v192_v38 = vld [vmem:[#allocation7 + $0x60] sm:$0xff]  ;;  %v193_v39 = vld [vmem:[#allocation7 + $0x68] sm:$0xff]  ;;  %v190_v40 = vld [vmem:[#allocation7 + $0x50] sm:$0xff] }
  0x24   :  { %162 = vmatpush.msra.mxu1 %v148_v10  ;;  %220 = vmatpush.msra.mxu2 %v204_v26  ;;  %v191_v41 = vld [vmem:[#allocation7 + $0x58] sm:$0xff]  ;;  %v188_v42 = vld [vmem:[#allocation7 + $0x40] sm:$0xff]  ;;  %v189_v43 = vld [vmem:[#allocation7 + $0x48] sm:$0xff] }
  0x25   :  { %240 = vmatpush.msra.mxu3 %v205_v27  ;;  %v186_v44 = vld [vmem:[#allocation7 + $0x30] sm:$0xff]  ;;  %v187_v45 = vld [vmem:[#allocation7 + $0x38] sm:$0xff]  ;;  %v300_v46 = vld [vmem:[%s511_s4] ss:$0 sm:$0xff] }
  0x26   :  { %163 = vmatpush.msra.mxu1 %v147_v11  ;;  %221 = vmatpush.msra.mxu2 %v202_v28  ;;  %v301_v47 = vld [vmem:[%s511_s4 + $0x1] ss:$0 sm:$0xff]  ;;  %v185_v53 = vld [vmem:[#allocation7 + $0x28] sm:$0xff]  ;;  %v182_v54 = vld [vmem:[#allocation7 + $0x10] sm:$0xff] }
  0x27   :  { %241 = vmatpush.msra.mxu3 %v203_v29  ;;  %v184_v52 = vld [vmem:[#allocation7 + $0x20] sm:$0xff]  ;;  %v183_v55 = vld [vmem:[#allocation7 + $0x18] sm:$0xff]  ;;  %v181_v57 = vld [vmem:[#allocation7 + $0x8] sm:$0xff] }
  0x28   :  { %164 = vmatpush.msra.mxu1 %v146_v12  ;;  %222 = vmatpush.msra.mxu2 %v200_v30  ;;  %v180_v56 = vld [vmem:[#allocation7] sm:$0xff] }
  0x29   :  { %242 = vmatpush.msra.mxu3 %v201_v31  ;;  %v302_v58 = vld [vmem:[%s511_s4 + $0x2] ss:$0 sm:$0xff]  ;;  %v303_v59 = vld [vmem:[%s511_s4 + $0x3] ss:$0 sm:$0xff] }
  0x2a   :  { %165 = vmatpush.msra.mxu1 %v145_v13  ;;  %223 = vmatpush.msra.mxu2 %v198_v32  ;;  %v102_v0 = vld [vmem:[#allocation9] ss:$4 sm:$0x3]  ;;  %v104_v1 = vld [vmem:[#allocation9 + $0x1] ss:$4 sm:$0x3] }
  0x2b   :  { %243 = vmatpush.msra.mxu3 %v199_v33  ;;  %v213_v2 = vperm.slane %v102_v0, 0  ;;  %v260_v3 = vperm.slane %v104_v1, 0  ;;  %v214_v4 = vperm.slane %v102_v0, 1  ;;  %v106_v5 = vld [vmem:[#allocation9 + $0x2] ss:$4 sm:$0x3] }
  0x2c   :  { %166 = vmatpush.msra.mxu1 %v144_v14  ;;  %224 = vmatpush.msra.mxu2 %v196_v34  ;;  %v269_v9 = vperm.slane %v106_v5, 0  ;;  %v261_v12 = vperm.slane %v104_v1, 1 }
  0x2d   :  { %244 = vmatpush.msra.mxu3 %v197_v35 }
  0x2e   :  { %167 = vmatpush.msra.mxu1 %v143_v15  ;;  %225 = vmatpush.msra.mxu2 %v194_v36 }
  0x2f   :  { %245 = vmatpush.msra.mxu3 %v195_v37 }
  0x30   :  { %168 = vmatpush.msra.mxu1 %v142_v16  ;;  %226 = vmatpush.msra.mxu2 %v192_v38  ;;  %v270_v16 = vperm.slane %v106_v5, 1 }
  0x31   :  { %246 = vmatpush.msra.mxu3 %v193_v39 }
  0x32   :  { %169 = vmatpush.msra.mxu1 %v141_v17  ;;  %227 = vmatpush.msra.mxu2 %v190_v40 }
  0x33   :  { %247 = vmatpush.msra.mxu3 %v191_v41 }
  0x34   :  { %170 = vmatpush.msra.mxu1 %v140_v18  ;;  %228 = vmatpush.msra.mxu2 %v188_v42 }
  0x35   :  { %248 = vmatpush.msra.mxu3 %v189_v43 }
  0x36   :  { %171 = vmatpush.msra.mxu1 %v139_v19  ;;  %229 = vmatpush.msra.mxu2 %v186_v44 }
  0x37   :  { %249 = vmatpush.msra.mxu3 %v187_v45 }
  0x38   :  { %230 = vmatpush.msra.mxu2 %v184_v52 }
  0x39   :  { %250 = vmatpush.msra.mxu3 %v185_v53 }
  0x3a   :  { %231 = vmatpush.msra.mxu2 %v182_v54 }
  0x3b   :  { %251 = vmatpush.msra.mxu3 %v183_v55 }
  0x3c   :  { %232 = vmatpush.msra.mxu2 %v180_v56 }
  0x3d   :  { %252 = vmatpush.msra.mxu3 %v181_v57 }
  0x99   :  { %v132_v48 = vpop.f32.mrf.mxu0 }
  0x9a   :  { %v133_v49 = vadd.f32 %v300_v46, %v132_v48 }
  0x9c   :  { %vm135_vm1 = vcmp.gt.f32.partialorder %v133_v49, 0.0  ;;  %v137_v50 = vmul.f32 %v301_v47, %v133_v49 }
  0x9e   :  { %v138_v51 = vsel %vm135_vm1, %v133_v49, %v137_v50 }
  0x9f   :  { %172 = vmatmul.f32.vlgmr.msra.gmra.mxu1 %v138_v51 }
 0x11c   :  { %v173_v60 = vpop.f32.mrf.mxu1 }
 0x11d   :  { %v174_v61 = vadd.f32 %v302_v58, %v173_v60 }
 0x11f   :  { %vm176_vm2 = vcmp.gt.f32.partialorder %v174_v61, 0.0  ;;  %v178_v62 = vmul.f32 %v303_v59, %v174_v61 }
 0x121   :  { %v179_v63 = vsel %vm176_vm2, %v174_v61, %v178_v62 }
 0x122   :  { %233 = vmatmul.f32.vlgmr.msra.gmra.mxu2 %v179_v63  ;;  %253 = vmatmul.f32.vlgmr.msra.gmra.mxu3 %v179_v63 }
 0x1a5   :  { %v234_v6 = vpop.f32.mrf.mxu2  ;;  %v254_v7 = vpop.f32.mrf.mxu3 }
 0x1a6   :  { %v235_v8 = vadd.f32 %v234_v6, %v213_v2  ;;  %v255_v11 = vadd.f32 %v254_v7, %v214_v4 }
 0x1a8   :  { %v264_v10 = vmul.f32 %v260_v3, %v235_v8  ;;  %vm257_vm3 = vcmp.gt.f32.partialorder %v235_v8, 0.0  ;;  %v265_v15 = vmul.f32 %v261_v12, %v255_v11  ;;  %vm258_vm4 = vcmp.gt.f32.partialorder %v255_v11, 0.0 }
 0x1aa   :  { %v266_v13 = vsel %vm257_vm3, %v235_v8, %v264_v10  ;;  %v267_v17 = vsel %vm258_vm4, %v255_v11, %v265_v15 }
 0x1ab   :  { %v273_v14 = vmul.f32 %v269_v9, %v266_v13  ;;  %v274_v18 = vmul.f32 %v270_v16, %v267_v17 }
 0x1ad   :  { %275 = vadd.xlane.f32.xlu0 %v273_v14 }
 0x1b5   :  { %277 = vadd.xlane.f32.xlu0 %v274_v18 }
 0x220   :  { %v276_v19 = vpop.xlane.xlu0 %275 }
 0x221   :  { %280 = vst.msk [vmem:[%s513_s6] sm:$0xff] %vm279_vm5, %v276_v19 }
 0x228   :  { %v278_v20 = vpop.xlane.xlu0 %277 }
 0x229   :  { %282 = vst.msk [vmem:[%s513_s6] sm:$0xff] %vm281_vm6, %v278_v20 }
 0x22a   :  { %287 = vsyncpa [#allocation3], 1 }
 0x22b   :  { %288 = vsyncpa [#allocation5], 1 }
 0x22c   :  { %289 = vsyncpa [#allocation8], 1 }

</bundles_post_ra>
